<compile_context>
chip_gen: v5e
topology: v5e:2x2
jax: 0.10.0
libtpu: 0.0.40
codegen_flags: <defaults>
</compile_context>

<pallas_src>
import math
import functools

import jax
import jax.numpy as jnp
from jax.experimental import pallas as pl
from jax.experimental.pallas import tpu as pltpu

_MIB = 1024 * 1024


def _round_up(n, m):
    return (n + m - 1) // m * m


def _gelu_exact(x):
    # torch.nn.functional.gelu default == exact erf formulation
    return 0.5 * x * (1.0 + jax.lax.erf(x * (1.0 / math.sqrt(2.0))))


def mlp_kernel(x_ref, w1_ref, b1_ref, w2_ref, b2_ref, o_ref, acc_ref, *,
               approximate_gelu, single_f_step):
    # fc1 slice on the MXU: (tm, H) @ (H, tf) -> (tm, tf), f32 accumulation.
    h = jnp.dot(x_ref[...], w1_ref[...], preferred_element_type=jnp.float32)
    h = h + b1_ref[...]                    # (1, tf) row-vector broadcast, f32
    if approximate_gelu:
        h = jax.nn.gelu(h, approximate=True)   # tanh form -> EUP slot
    else:
        h = _gelu_exact(h)                     # erf parity with torch default
    # TODO(synk): dropout is identity here (inference / eval mode); training-mode
    # stochastic dropout would use pltpu.prng_seed + pltpu.prng_random_bits.

    # fc2 partial reduction over this F slice: (tm, tf) @ (tf, H) -> (tm, H).
    part = jnp.dot(h.astype(w2_ref.dtype), w2_ref[...],
                   preferred_element_type=jnp.float32)

    if single_f_step:
        # Whole F in one step: bypass the accumulator entirely.
        o_ref[...] = (part + b2_ref[...]).astype(o_ref.dtype)
    else:
        f = pl.program_id(1)

        @pl.when(f == 0)
        def _():
            acc_ref[...] = part            # direct write, no zero-init + RMW

        @pl.when(f > 0)
        def _():
            acc_ref[...] += part

        @pl.when(f == pl.num_programs(1) - 1)
        def _():
            o_ref[...] = (acc_ref[...] + b2_ref[...]).astype(o_ref.dtype)


def _select_tiles(M, H, F, tm_req, tf_req, comp_bytes, out_bytes):
    """Pick (Mp, tm, tf, vmem_limit) from a VMEM budget derived from hardware."""
    try:
        info = pltpu.get_tpu_info()
        phys_vmem = int(getattr(info, "vmem_capacity_bytes", 64 * _MIB))
    except Exception:
        phys_vmem = 64 * _MIB              # conservative (v7x per-TC) fallback
    budget = int(phys_vmem * 0.75)         # headroom for compiler scratch/spill

    Mp = _round_up(max(M, 1), 8)           # pad rows only to a multiple of 8
    tm = min(_round_up(max(tm_req, 8), 8), Mp)
    # Keep >= 2 row tiles when M is big so the "parallel" axis can shard
    # across both TensorCores on dual-TC chips (v7x).
    if tm >= Mp and Mp >= 256:
        tm = _round_up((Mp + 1) // 2, 8)

    # F-tile candidates in preference order.  Full F first (weights then get
    # DMAed from HBM exactly once total); otherwise the largest lane-aligned
    # divisor of F that fits the VMEM budget.
    if tf_req is None or tf_req >= F:
        cands = [F]
        top = F - 128
    else:
        cands = []
        top = (max(tf_req, 128) // 128) * 128
    if F % 128 == 0:
        for c in range(min(top, F), 127, -128):
            if F % c == 0 and c not in cands:
                cands.append(c)
    if not cands:
        cands = [F]

    def footprint(tm_, tf_):
        fb = 2 * tm_ * H * comp_bytes                       # x tile (2-buffered)
        fb += 2 * H * tf_ * comp_bytes                      # W1 slab
        fb += 2 * tf_ * H * comp_bytes                      # W2 slab
        fb += 2 * max(tf_, 128) * 4 + 2 * max(H, 128) * 4   # biases
        fb += 2 * tm_ * H * out_bytes                       # output tile
        fb += tm_ * H * 4                                   # f32 accumulator
        fb += tm_ * tf_ * (4 + comp_bytes)                  # gelu temp + cast
        return fb

    tf = None
    for c in cands:
        if footprint(tm, c) <= budget:
            tf = c
            break
    if tf is None:
        tf = cands[-1]
        while footprint(tm, tf) > budget and tm > 64:
            tm = max(64, _round_up(tm // 2, 8))
    tm = min(tm, Mp)

    vmem_limit = int(footprint(tm, tf) * 1.25) + 8 * _MIB
    vmem_limit = max(32 * _MIB, min(vmem_limit, phys_vmem - 2 * _MIB))
    return Mp, tm, tf, vmem_limit


@functools.partial(jax.jit,
                   static_argnames=("tm", "tf", "compute_dtype", "approximate_gelu"))
def mlp_forward(x, w1, b1, w2, b2, *, tm=512, tf=None,
                compute_dtype=jnp.bfloat16, approximate_gelu=True):
    """x: (B, S, H); w1: (H, F); b1: (F,); w2: (F, H); b2: (H,).

    compute_dtype: dtype for x / W1 / W2 fed to the MXU (default bf16 for peak
    matmul rate and halved weight HBM traffic).  Bias-add / GELU / accumulation
    stay f32.  approximate_gelu=False gives exact-erf parity with torch.
    """
    B, S, H = x.shape
    F = w1.shape[1]
    M = B * S
    out_dtype = x.dtype

    if compute_dtype is not None:
        if compute_dtype != x.dtype:
            x = x.astype(compute_dtype)
        w1 = w1.astype(compute_dtype)
        w2 = w2.astype(compute_dtype)

    # Biases stay f32; added to the f32 intermediate / accumulator.
    b1_2 = b1.astype(jnp.float32).reshape(1, F)
    b2_2 = b2.astype(jnp.float32).reshape(1, H)

    comp_bytes = jnp.dtype(x.dtype).itemsize
    out_bytes = jnp.dtype(out_dtype).itemsize
    Mp, tm_eff, tf_eff, vmem_limit = _select_tiles(
        M, H, F, tm, tf, comp_bytes, out_bytes)

    x2 = x.reshape(M, H)
    if Mp != M:
        x2 = jnp.pad(x2, ((0, Mp - M), (0, 0)))   # at most 7 padded rows

    grid_m = pl.cdiv(Mp, tm_eff)                  # ragged last row tile is OK
    num_f = F // tf_eff

    # When the F axis is tiled, W1/W2 are re-streamed once per row tile.
    weight_reps = 1 if num_f == 1 else grid_m
    cost = pl.CostEstimate(
        flops=4 * M * H * F,                      # two matmuls
        transcendentals=M * F,                    # one gelu transcendental / elem
        bytes_accessed=(Mp * H * comp_bytes                    # x
                        + weight_reps * 2 * H * F * comp_bytes  # W1 + W2
                        + (F + H) * 4                           # biases
                        + Mp * H * out_bytes),                  # out
    )

    kernel = functools.partial(mlp_kernel,
                               approximate_gelu=approximate_gelu,
                               single_f_step=(num_f == 1))

    out = pl.pallas_call(
        kernel,
        out_shape=jax.ShapeDtypeStruct((Mp, H), out_dtype),
        grid_spec=pltpu.PrefetchScalarGridSpec(
            num_scalar_prefetch=0,
            grid=(grid_m, num_f),
            in_specs=[
                pl.BlockSpec((tm_eff, H), lambda i, f: (i, 0)),   # x rows (resident across f)
                pl.BlockSpec((H, tf_eff), lambda i, f: (0, f)),   # W1 column slab
                pl.BlockSpec((1, tf_eff), lambda i, f: (0, f)),   # b1 slab
                pl.BlockSpec((tf_eff, H), lambda i, f: (f, 0)),   # W2 row slab
                pl.BlockSpec((1, H), lambda i, f: (0, 0)),        # b2 (constant block)
            ],
            out_specs=pl.BlockSpec((tm_eff, H), lambda i, f: (i, 0)),
            scratch_shapes=[pltpu.VMEM((tm_eff, H), jnp.float32)],  # f32 accumulator
        ),
        compiler_params=pltpu.CompilerParams(
            dimension_semantics=("parallel", "arbitrary"),
            vmem_limit_bytes=vmem_limit,
        ),
        cost_estimate=cost,
    )(x2, w1, b1_2, w2, b2_2)

    if Mp != M:
        out = out[:M]
    return out.reshape(B, S, H)


def _mlp_reference(x, w1, b1, w2, b2, compute_dtype=None, approximate_gelu=True):
    """Pure-JAX reference mirroring the kernel's compute dtype / GELU choice."""
    B, S, H = x.shape
    out_dtype = x.dtype
    x2 = x.reshape(-1, H)
    if compute_dtype is not None:
        x2 = x2.astype(compute_dtype)
        w1 = w1.astype(compute_dtype)
        w2 = w2.astype(compute_dtype)
    h = jnp.dot(x2, w1, preferred_element_type=jnp.float32,
                precision=jax.lax.Precision.HIGHEST) + b1.astype(jnp.float32)
    h = jax.nn.gelu(h, approximate=True) if approximate_gelu else _gelu_exact(h)
    y = jnp.dot(h.astype(w2.dtype), w2, preferred_element_type=jnp.float32,
                precision=jax.lax.Precision.HIGHEST) + b2.astype(jnp.float32)
    return y.reshape(B, S, H).astype(out_dtype)


def init_params(key, hidden_size, mlp_dim, dtype=jnp.float32):
    """Deterministic init matching the PyTorch module's _init_weights:
    xavier_uniform_ on weights, normal(std=1e-6) on biases."""
    k1, k2, k3, k4 = jax.random.split(key, 4)

    def xavier_uniform(k, fan_in, fan_out):
        limit = math.sqrt(6.0 / (fan_in + fan_out))
        # torch Linear weight shape is (out, in); we store the transpose (in, out)
        return jax.random.uniform(k, (fan_in, fan_out), dtype=dtype,
                                  minval=-limit, maxval=limit)

    w1 = xavier_uniform(k1, hidden_size, mlp_dim)         # fc1.weight.T
    b1 = 1e-6 * jax.random.normal(k2, (mlp_dim,), dtype=dtype)
    w2 = xavier_uniform(k3, mlp_dim, hidden_size)         # fc2.weight.T
    b2 = 1e-6 * jax.random.normal(k4, (hidden_size,), dtype=dtype)
    return w1, b1, w2, b2


if __name__ == "__main__":
    # --- small demo shapes: exact-parity mode (f32 matmuls + erf GELU) -------
    B, S, H, F = 2, 8, 32, 64   # batch, seq, hidden_size, mlp_dim
    key = jax.random.PRNGKey(0)
    kx, kp = jax.random.split(key)
    x = jax.random.normal(kx, (B, S, H), dtype=jnp.float32)
    w1, b1, w2, b2 = init_params(kp, H, F)

    y = mlp_forward(x, w1, b1, w2, b2, compute_dtype=None, approximate_gelu=False)
    jax.block_until_ready(y)
    ref = _mlp_reference(x, w1, b1, w2, b2, compute_dtype=None, approximate_gelu=False)
    assert jnp.allclose(y, ref, atol=1e-4, rtol=1e-4), "small-shape mismatch"

    # --- larger check, fast path (bf16 MXU + tanh GELU), row tiling / 2 tiles
    B2, S2, H2, F2 = 2, 256, 256, 1024
    kx2, kp2 = jax.random.split(jax.random.PRNGKey(1))
    x_l = jax.random.normal(kx2, (B2, S2, H2), dtype=jnp.float32)
    params_l = init_params(kp2, H2, F2)

    y_l = mlp_forward(x_l, *params_l)   # defaults: bf16, tanh GELU, auto tiles
    jax.block_until_ready(y_l)
    ref_l = _mlp_reference(x_l, *params_l,
                           compute_dtype=jnp.bfloat16, approximate_gelu=True)
    assert jnp.allclose(y_l, ref_l, atol=2e-3, rtol=2e-3), "tiled-shape mismatch"

    # --- forced F tiling: exercises the reduction grid axis + accumulator ----
    y_t = mlp_forward(x_l, *params_l, tm=256, tf=256)
    jax.block_until_ready(y_t)
    assert jnp.allclose(y_t, ref_l, atol=2e-3, rtol=2e-3), "f-tiled mismatch"

    print("KERNEL_OK")
</pallas_src>

<mosaic_0001>
module attributes {stable_mosaic.version = 11 : i64} {
  func.func @mlp_kernel(%arg0: i32, %arg1: i32, %arg2: memref<16x32xf32, #tpu.memory_space<vmem>>, %arg3: memref<32x64xf32, #tpu.memory_space<vmem>>, %arg4: memref<1x64xf32, #tpu.memory_space<vmem>>, %arg5: memref<64x32xf32, #tpu.memory_space<vmem>>, %arg6: memref<1x32xf32, #tpu.memory_space<vmem>>, %arg7: memref<16x32xf32, #tpu.memory_space<vmem>>, %arg8: memref<16x32xf32, #tpu.memory_space<vmem>>) attributes {dimension_semantics = [#tpu.dimension_semantics<parallel>, #tpu.dimension_semantics<arbitrary>], iteration_bounds = array<i64: 1, 1>, scalar_prefetch = 0 : i64, scratch_operands = 1 : i64, tpu.core_type = #tpu.core_type<tc>, window_params = [{transform_indices = @transform_0, window_bounds = array<i64: 16, 32>}, {transform_indices = @transform_1, window_bounds = array<i64: 32, 64>}, {transform_indices = @transform_2, window_bounds = array<i64: 1, 64>}, {transform_indices = @transform_3, window_bounds = array<i64: 64, 32>}, {pipeline_mode = #tpu.pipeline_mode<synchronous>, transform_indices = @transform_4, window_bounds = array<i64: 1, 32>}, {transform_indices = @transform_5, window_bounds = array<i64: 16, 32>}]} {
    %c0 = arith.constant 0 : index
    %c0_0 = arith.constant 0 : index
    %0 = vector.load %arg2[%c0, %c0_0] : memref<16x32xf32, #tpu.memory_space<vmem>>, vector<16x32xf32>
    %c0_1 = arith.constant 0 : index
    %c0_2 = arith.constant 0 : index
    %1 = vector.load %arg3[%c0_1, %c0_2] : memref<32x64xf32, #tpu.memory_space<vmem>>, vector<32x64xf32>
    %cst = arith.constant dense<0.000000e+00> : vector<16x64xf32>
    %2 = tpu.matmul %0, %1, %cst {dimension_numbers = #tpu.dot_dimension_numbers<[1], [0], [0], [1], [0, 0, 1, 1], [], []>} : vector<16x32xf32>, vector<32x64xf32>, vector<16x64xf32> -> vector<16x64xf32>
    %c0_3 = arith.constant 0 : index
    %c0_4 = arith.constant 0 : index
    %3 = vector.load %arg4[%c0_3, %c0_4] : memref<1x64xf32, #tpu.memory_space<vmem>>, vector<1x64xf32>
    %4 = vector.broadcast %3 : vector<1x64xf32> to vector<16x64xf32>
    %5 = arith.addf %2, %4 : vector<16x64xf32>
    %cst_5 = arith.constant 5.000000e-01 : f32
    %6 = vector.broadcast %cst_5 : f32 to vector<16x64xf32>
    %7 = arith.mulf %6, %5 : vector<16x64xf32>
    %cst_6 = arith.constant 0.707106769 : f32
    %8 = vector.broadcast %cst_6 : f32 to vector<16x64xf32>
    %9 = arith.mulf %5, %8 : vector<16x64xf32>
    %10 = math.erf %9 : vector<16x64xf32>
    %cst_7 = arith.constant 1.000000e+00 : f32
    %11 = vector.broadcast %cst_7 : f32 to vector<16x64xf32>
    %12 = arith.addf %11, %10 : vector<16x64xf32>
    %13 = arith.mulf %7, %12 : vector<16x64xf32>
    %c0_8 = arith.constant 0 : index
    %c0_9 = arith.constant 0 : index
    %14 = vector.load %arg5[%c0_8, %c0_9] : memref<64x32xf32, #tpu.memory_space<vmem>>, vector<64x32xf32>
    %cst_10 = arith.constant dense<0.000000e+00> : vector<16x32xf32>
    %15 = tpu.matmul %13, %14, %cst_10 {dimension_numbers = #tpu.dot_dimension_numbers<[1], [0], [0], [1], [0, 0, 1, 1], [], []>} : vector<16x64xf32>, vector<64x32xf32>, vector<16x32xf32> -> vector<16x32xf32>
    %c0_11 = arith.constant 0 : index
    %c0_12 = arith.constant 0 : index
    %16 = vector.load %arg6[%c0_11, %c0_12] : memref<1x32xf32, #tpu.memory_space<vmem>>, vector<1x32xf32>
    %17 = vector.broadcast %16 : vector<1x32xf32> to vector<16x32xf32>
    %18 = arith.addf %15, %17 : vector<16x32xf32>
    %c0_13 = arith.constant 0 : index
    %c0_14 = arith.constant 0 : index
    %19 = vector.load %arg7[%c0_13, %c0_14] : memref<16x32xf32, #tpu.memory_space<vmem>>, vector<16x32xf32>
    tpu.vector_store %arg7[%c0_13, %c0_14], %18 {strides = array<i32>} : memref<16x32xf32, #tpu.memory_space<vmem>>, vector<16x32xf32>,
    return
  }
  func.func @transform_0(%arg0: i32, %arg1: i32) -> (i32, i32) {
    %c0_i32 = arith.constant 0 : i32
    %c0_i32_0 = arith.constant 0 : i32
    return %arg0, %c0_i32 : i32, i32
  }
  func.func @transform_1(%arg0: i32, %arg1: i32) -> (i32, i32) {
    %c0_i32 = arith.constant 0 : i32
    %c0_i32_0 = arith.constant 0 : i32
    return %c0_i32, %arg1 : i32, i32
  }
  func.func @transform_2(%arg0: i32, %arg1: i32) -> (i32, i32) {
    %c0_i32 = arith.constant 0 : i32
    %c0_i32_0 = arith.constant 0 : i32
    return %c0_i32, %arg1 : i32, i32
  }
  func.func @transform_3(%arg0: i32, %arg1: i32) -> (i32, i32) {
    %c0_i32 = arith.constant 0 : i32
    %c0_i32_0 = arith.constant 0 : i32
    return %arg1, %c0_i32 : i32, i32
  }
  func.func @transform_4(%arg0: i32, %arg1: i32) -> (i32, i32) {
    %c0_i32 = arith.constant 0 : i32
    %c0_i32_0 = arith.constant 0 : i32
    %c0_i32_1 = arith.constant 0 : i32
    return %c0_i32, %c0_i32_0 : i32, i32
  }
  func.func @transform_5(%arg0: i32, %arg1: i32) -> (i32, i32) {
    %c0_i32 = arith.constant 0 : i32
    %c0_i32_0 = arith.constant 0 : i32
    return %arg0, %c0_i32 : i32, i32
  }
}

</mosaic_0001>

<bundles_post_ra>
// kernel: mlp_forward.1
= control target key start
LH: loop header
LB: loop body
LE: loop exit
PB: predicated region body
PF: predicated region fallthrough
CT: control target
= control target key end

     0   :  { %s382_s0 = inlined_call_operand.vmem [shape: f32[16,32], index: 0, kind: input, shape index: {}]   ;;  %s383_s1 = inlined_call_operand.vmem [shape: f32[32,64], index: 1, kind: input, shape index: {}]   ;;  %s384_s2 = inlined_call_operand.vmem [shape: f32[1,64], index: 2, kind: input, shape index: {}]   ;;  %s385_s3 = inlined_call_operand.vmem [shape: f32[64,32], index: 3, kind: input, shape index: {}]   ;;  %s386_s4 = inlined_call_operand.vmem [shape: f32[1,32], index: 4, kind: input, shape index: {}]   ;;  %s387_s5 = inlined_call_operand.hbm [shape: f32[16,32], index: 5, kind: output, shape index: {}]  }
   0x1   :  { %v26_v0 = vld [vmem:[%s383_s1 + $0x18] sm:$0xff]  ;;  %v25_v1 = vld [vmem:[%s383_s1 + $0x10] sm:$0xff]  ;;  %v24_v2 = vld [vmem:[%s383_s1 + $0x8] sm:$0xff] }
   0x2   :  { %50 = vmatpush.msra.mxu0 %v26_v0  ;;  %217 = vmatpush.msra.mxu3 %v26_v0 }
   0x4   :  { %51 = vmatpush.msra.mxu0 %v25_v1  ;;  %218 = vmatpush.msra.mxu3 %v25_v1 }
   0x5   :  { %10 = vsyncpa [#allocation4], 0  ;;  %v23_v3 = vld [vmem:[%s383_s1] sm:$0xff]  ;;  %vm31_vm0 = vcmask 261120   ;;  %v22_v5 = vld [vmem:[%s382_s0 + $0x8] sm:$0xff]  ;;  %vm161_vm9 = vcmask 523264  }
   0x6   :  { %52 = vmatpush.msra.mxu0 %v24_v2  ;;  %219 = vmatpush.msra.mxu3 %v24_v2  ;;  %v21_v4 = vld [vmem:[%s382_s0] sm:$0xff]  ;;  %v156_v14 = vld [vmem:[%s385_s3 + $0x38] sm:$0xff]  ;;  %v155_v18 = vld [vmem:[%s385_s3 + $0x30] sm:$0xff]  ;;  %s264_s21 = smov [#allocation3]   ;;  %s199_s25 = sshll.u32 %s387_s5, 4  ;;  %s200_s25 = int_to_ptr.hbm [resolvable:$true] %s199_s25 }
   0x7   :  { %v232_v6 = vld [vmem:[%s384_s2] ss:$0 sm:$0xff]  ;;  %176 = vmatpush.msra.mxu1 %v156_v14  ;;  %221 = vmatpush.msra.mxu2 %v156_v14  ;;  %v154_v22 = vld [vmem:[%s385_s3 + $0x28] sm:$0xff]  ;;  %v152_v31 = vld [vmem:[%s385_s3 + $0x18] sm:$0xff]  ;;  %s197_s22 = sshll.u32 %s264_s21, 4  ;;  %s265_s26 = smov 128   ;;  %s198_s22 = int_to_ptr.vmem [resolvable:$true] %s197_s22 }
   0x8   :  { %53 = vmatpush.msra.mxu0 %v23_v3  ;;  %220 = vmatpush.msra.mxu3 %v23_v3  ;;  %v153_v26 = vld [vmem:[%s385_s3 + $0x20] sm:$0xff]  ;;  %v151_v35 = vld [vmem:[%s385_s3 + $0x10] sm:$0xff]  ;;  %v150_v40 = vld [vmem:[%s385_s3 + $0x8] sm:$0xff]  ;;  %s266_s27 = smov 8  }
   0x9   :  { %211 = vmatmul.msk.f32.vlgmr.msra.gmra.mxu0 %vm31_vm0, %v21_v4  ;;  %212 = vmatmul.msk.f32.vlgmr.msra.gmra.mxu3 %vm31_vm0, %v22_v5  ;;  %v149_v42 = vld [vmem:[%s385_s3] sm:$0xff] }
   0xa   :  { %177 = vmatpush.msra.mxu1 %v155_v18  ;;  %222 = vmatpush.msra.mxu2 %v155_v18 }
   0xc   :  { %178 = vmatpush.msra.mxu1 %v154_v22  ;;  %223 = vmatpush.msra.mxu2 %v154_v22 }
   0xe   :  { %179 = vmatpush.msra.mxu1 %v153_v26  ;;  %224 = vmatpush.msra.mxu2 %v153_v26 }
  0x10   :  { %180 = vmatpush.msra.mxu1 %v152_v31  ;;  %225 = vmatpush.msra.mxu2 %v152_v31 }
  0x12   :  { %181 = vmatpush.msra.mxu1 %v151_v35  ;;  %226 = vmatpush.msra.mxu2 %v151_v35 }
  0x14   :  { %182 = vmatpush.msra.mxu1 %v150_v40  ;;  %227 = vmatpush.msra.mxu2 %v150_v40 }
  0x16   :  { %183 = vmatpush.msra.mxu1 %v149_v42  ;;  %228 = vmatpush.msra.mxu2 %v149_v42 }
  0x86   :  { %v55_v7 = vpop.f32.mrf.mxu0 }
  0x87   :  { %v320_v8 = vadd.f32 %v232_v6, %v55_v7 }
  0x89   :  { %v323_v9 = vmul.f32 0.70710677, %v320_v8  ;;  %v61_v26 = vmul.f32 0.5, %v320_v8  ;;  %v233_v8 = vld [vmem:[%s386_s4] ss:$0 sm:$0xff] }
  0x8b   :  { %v65_v10 = vmul.f32 %v323_v9, %v323_v9 }
  0x8c   :  { %v58_v11 = vpop.f32.mrf.mxu3 }
  0x8d   :  { %v327_v12 = vmin.f32 %v65_v10, 16.0  ;;  %v329_v13 = vadd.f32 %v232_v6, %v58_v11 }
  0x8f   :  { %v67_v15 = vmul.f32 2.1237322e-06, %v327_v12  ;;  %v78_v16 = vmul.f32 3.8918573e-05, %v327_v12  ;;  %v337_v17 = vmul.f32 0.70710677, %v329_v13 }
  0x91   :  { %v68_v19 = vadd.f32 0.00028619796, %v67_v15  ;;  %v79_v20 = vadd.f32 0.001143296, %v78_v16  ;;  %v105_v21 = vmul.f32 %v337_v17, %v337_v17 }
  0x93   :  { %v69_v23 = vmul.f32 %v68_v19, %v327_v12  ;;  %v80_v24 = vmul.f32 %v79_v20, %v327_v12  ;;  %v106_v25 = vmin.f32 %v105_v21, 16.0 }
  0x95   :  { %v70_v27 = vadd.f32 0.0036580483, %v69_v23  ;;  %v81_v28 = vadd.f32 0.014752088, %v80_v24  ;;  %v107_v29 = vmul.f32 2.1237322e-06, %v106_v25 }
  0x96   :  { %v118_v30 = vmul.f32 3.8918573e-05, %v106_v25 }
  0x97   :  { %v82_v32 = vmul.f32 %v81_v28, %v327_v12  ;;  %v108_v33 = vadd.f32 0.00028619796, %v107_v29  ;;  %v71_v37 = vmul.f32 %v70_v27, %v327_v12 }
  0x98   :  { %v119_v34 = vadd.f32 0.001143296, %v118_v30 }
  0x99   :  { %v83_v36 = vadd.f32 0.112945676, %v82_v32  ;;  %v109_v38 = vmul.f32 %v108_v33, %v106_v25  ;;  %v72_v46 = vadd.f32 0.05243302, %v71_v37  ;;  %v62_v33 = vmul.f32 0.5, %v329_v13 }
  0x9a   :  { %v120_v39 = vmul.f32 %v119_v34, %v106_v25 }
  0x9b   :  { %v84_v41 = vmul.f32 %v83_v36, %v327_v12  ;;  %v110_v45 = vadd.f32 0.0036580483, %v109_v38  ;;  %v73_v52 = vmul.f32 %v72_v46, %v327_v12 }
  0x9c   :  { %v121_v43 = vadd.f32 0.014752088, %v120_v39 }
  0x9d   :  { %v85_v44 = vadd.f32 0.4994258, %v84_v41  ;;  %v111_v51 = vmul.f32 %v110_v45, %v106_v25  ;;  %v74_v56 = vadd.f32 0.18741608, %v73_v52 }
  0x9e   :  { %v122_v47 = vmul.f32 %v121_v43, %v106_v25 }
  0x9f   :  { %v86_v48 = vmul.f32 %v85_v44, %v327_v12  ;;  %v112_v55 = vadd.f32 0.05243302, %v111_v51  ;;  %v75_v61 = vmul.f32 %v74_v56, %v327_v12 }
  0xa0   :  { %v123_v49 = vadd.f32 0.112945676, %v122_v47 }
  0xa1   :  { %v87_v50 = vadd.f32 1.0, %v86_v48  ;;  %v113_v60 = vmul.f32 %v112_v55, %v106_v25  ;;  %v76_v2 = vadd.f32 1.1283791, %v75_v61 }
  0xa2   :  { %v124_v53 = vmul.f32 %v123_v49, %v106_v25 }
  0xa3   :  { %234 = vrcp.f32 %v87_v50  ;;  %v99_v0 = vand.u32 2147483648, %v87_v50  ;;  %v114_v1 = vadd.f32 0.18741608, %v113_v60  ;;  %v97_v4 = vand.u32 2147483647, %v87_v50 }
  0xa4   :  { %v125_v54 = vadd.f32 0.4994258, %v124_v53  ;;  %vm93_vm2 = vweird.f32 %v87_v50  ;;  %v77_v14 = vmul.f32 %v76_v2, %v323_v9 }
  0xa5   :  { %v100_v7 = vor.u32 1.1754944e-38, %v99_v0  ;;  %v115_v10 = vmul.f32 %v114_v1, %v106_v25  ;;  %vm98_vm4 = vcmp.eq.f32.partialorder %v97_v4, 8.507059e+37 }
  0xa6   :  { %v126_v57 = vmul.f32 %v125_v54, %v106_v25 }
  0xa7   :  { %v116_v20 = vadd.f32 1.1283791, %v115_v10 }
  0xa8   :  { %v127_v58 = vadd.f32 1.0, %v126_v57 }
  0xa9   :  { %v235_v59 = vpop.eup %234  ;;  %v117_v9 = vmul.f32 %v116_v20, %v337_v17 }
  0xaa   :  { %v89_v62 = vmul.f32 %v235_v59, %v87_v50  ;;  %236 = vrcp.f32 %v127_v58  ;;  %vm94_vm1 = vweird.f32 %v235_v59  ;;  %v139_v19 = vand.u32 2147483648, %v127_v58 }
  0xab   :  { %vm95_vm3 = vmor %vm93_vm2, %vm94_vm1  ;;  %v137_v22 = vand.u32 2147483647, %v127_v58  ;;  %vm133_vm6 = vweird.f32 %v127_v58 }
  0xac   :  { %v90_v63 = vsub.f32 1.0, %v89_v62  ;;  %v140_v25 = vor.u32 1.1754944e-38, %v139_v19 }
  0xad   :  { %vm138_vm8 = vcmp.eq.f32.partialorder %v137_v22, 8.507059e+37 }
  0xae   :  { %v91_v3 = vmul.f32 %v235_v59, %v90_v63 }
  0xb0   :  { %v237_v5 = vpop.eup %236  ;;  %v92_v6 = vadd.f32 %v235_v59, %v91_v3 }
  0xb1   :  { %v129_v11 = vmul.f32 %v237_v5, %v127_v58  ;;  %vm134_vm5 = vweird.f32 %v237_v5 }
  0xb2   :  { %v96_v15 = vsel %vm95_vm3, %v235_v59, %v92_v6  ;;  %vm135_vm7 = vmor %vm133_vm6, %vm134_vm5 }
  0xb3   :  { %v101_v12 = vsel %vm98_vm4, %v100_v7, %v96_v15  ;;  %v130_v16 = vsub.f32 1.0, %v129_v11 }
  0xb4   :  { %v102_v18 = vmul.f32 %v101_v12, %v77_v14 }
  0xb5   :  { %v131_v21 = vmul.f32 %v237_v5, %v130_v16 }
  0xb6   :  { %v213_v23 = vclamps-f32 %v102_v18, 1.0 }
  0xb7   :  { %v132_v24 = vadd.f32 %v237_v5, %v131_v21 }
  0xb8   :  { %v145_v27 = vadd.f32 1.0, %v213_v23 }
  0xb9   :  { %v136_v28 = vsel %vm135_vm7, %v237_v5, %v132_v24 }
  0xba   :  { %v141_v29 = vsel %vm138_vm8, %v140_v25, %v136_v28  ;;  %v147_v30 = vmul.f32 %v145_v27, %v61_v26 }
  0xbb   :  { %v142_v31 = vmul.f32 %v141_v29, %v117_v9 }
  0xbc   :  { %215 = vmatmul.msk.f32.vlgmr.msra.gmra.mxu1 %vm161_vm9, %v147_v30 }
  0xbd   :  { %v214_v32 = vclamps-f32 %v142_v31, 1.0 }
  0xbf   :  { %v146_v34 = vadd.f32 1.0, %v214_v32 }
  0xc1   :  { %v148_v35 = vmul.f32 %v146_v34, %v62_v33 }
  0xc3   :  { %216 = vmatmul.msk.f32.vlgmr.msra.gmra.mxu2 %vm161_vm9, %v148_v35 }
 0x139   :  { %v185_v36 = vpop.f32.mrf.mxu1 }
 0x13a   :  { %v186_v37 = vadd.f32 %v233_v8, %v185_v36 }
 0x13c   :  { %191 = vst.msk [vmem:[#allocation3] sm:$0xff] %vm31_vm0, %v186_v37 }
 0x146   :  { %v188_v17 = vpop.f32.mrf.mxu2 }
 0x147   :  { %v189_v13 = vadd.f32 %v233_v8, %v188_v17 }
 0x149   :  { %192 = vst.msk [vmem:[#allocation3 + $0x8] sm:$0xff] %vm31_vm0, %v189_v13 }
 0x14a   :  { %205 = dma.vmem_to_hbm [thread:$0]  %s198_s22, 256, %s200_s25, [#allocation4], %s265_s26, %s265_s26, %s266_s27  }
 0x14b   :  { %262 = dma.done.wait [#allocation4], 256  }
 0x14c   :  { %263 = vsyncadd [#allocation4], 4294967040 }
 0x14d   :  { %210 = vsyncpa [#allocation4], 1 }

</bundles_post_ra>
